<compile_context>
chip_gen: v5e
topology: v5e:2x2
jax: 0.10.0
libtpu: 0.0.40
codegen_flags: <defaults>
</compile_context>

<pallas_src>
import jax
import jax.numpy as jnp
from jax.experimental import pallas as pl
from jax.experimental.pallas import tpu as pltpu


_LANE = 1024           # lane-dense last dim (multiple of 128) -> unmasked vst
_MAX_TILE_ROWS = 256   # (256, 1024) f32 tile = 1 MiB per operand


def _poisson_encode_kernel(x_ref, u_ref, o_ref):
    """Elementwise stateless (Poisson/Bernoulli) spike encoding.

    x_ref : VMEM (TR, LANE) -- input firing probabilities in [0, 1]
    u_ref : VMEM (TR, LANE) -- uniform randoms in [0, 1)
    o_ref : VMEM (TR, LANE) -- output spikes (0/1), same dtype as x
    """
    # spike = (rand <= x).to(x)
    o_ref[...] = (u_ref[...] <= x_ref[...]).astype(o_ref.dtype)


def _round_up(a: int, b: int) -> int:
    return pl.cdiv(a, b) * b


def stateless_encoder_forward(x: jax.Array, key: jax.Array) -> jax.Array:
    """Pallas forward for StatelessEncoder (PoissonEncoder semantics).

    x  : float array of firing probabilities (any shape, e.g. NCHW).
    key: jax.random key; a fresh key should be passed per call so each SNN
         timestep gets independent spikes.
    Returns spikes with the same shape and dtype as x.
    """
    orig_shape = x.shape
    dtype = x.dtype
    total = x.size

    rows = pl.cdiv(total, _LANE)
    tile_rows = min(_MAX_TILE_ROWS, _round_up(rows, 8))   # sublane multiple
    rows_padded = _round_up(rows, tile_rows)
    padded_total = rows_padded * _LANE

    # Flatten + pad into a lane-dense 2-D slab; tail is sliced off at the end.
    x_flat = jnp.pad(x.reshape(-1), (0, padded_total - total))
    x2d = x_flat.reshape(rows_padded, _LANE)

    # Uniform randoms generated outside the kernel (works on TPU and in
    # interpret mode; independent of the tiling).
    u_dtype = dtype if jnp.issubdtype(dtype, jnp.floating) else jnp.float32
    u2d = jax.random.uniform(key, (rows_padded, _LANE), dtype=u_dtype)

    grid = (rows_padded // tile_rows,)
    spike2d = pl.pallas_call(
        _poisson_encode_kernel,
        out_shape=jax.ShapeDtypeStruct((rows_padded, _LANE), dtype),
        grid=grid,
        in_specs=[
            pl.BlockSpec((tile_rows, _LANE), lambda i: (i, 0)),   # x tile
            pl.BlockSpec((tile_rows, _LANE), lambda i: (i, 0)),   # u tile
        ],
        out_specs=pl.BlockSpec((tile_rows, _LANE), lambda i: (i, 0)),
        compiler_params=pltpu.CompilerParams(
            dimension_semantics=("parallel",)),
    )(x2d, u2d)

    return spike2d.reshape(-1)[:total].reshape(orig_shape)


if __name__ == "__main__":
    # TODO(synk): the base-class forward is abstract (raises NotImplementedError);
    # we implement the canonical concrete stateless encoder (PoissonEncoder).
    key = jax.random.PRNGKey(0)
    kx, kenc = jax.random.split(key)
    x = jax.random.uniform(kx, (2, 4, 16, 16), dtype=jnp.float32)  # probs in [0,1)

    spike = stateless_encoder_forward(x, kenc)
    spike = jax.block_until_ready(spike)

    # Sanity checks: same shape/dtype, values are binary spikes, and the spike
    # rate tracks the input probabilities.
    assert spike.shape == x.shape
    assert spike.dtype == x.dtype
    assert bool(jnp.all((spike == 0.0) | (spike == 1.0)))
    assert abs(float(spike.mean()) - float(x.mean())) < 0.1

    print("KERNEL_OK")
</pallas_src>

<mosaic_0001>
module attributes {stable_mosaic.version = 11 : i64} {
  func.func @_poisson_encode_kernel(%arg0: i32, %arg1: memref<8x1024xf32, #tpu.memory_space<vmem>>, %arg2: memref<8x1024xf32, #tpu.memory_space<vmem>>, %arg3: memref<8x1024xf32, #tpu.memory_space<vmem>>) attributes {dimension_semantics = [#tpu.dimension_semantics<parallel>], iteration_bounds = array<i64: 1>, scalar_prefetch = 0 : i64, scratch_operands = 0 : i64, tpu.core_type = #tpu.core_type<tc>, window_params = [{transform_indices = @transform_0, window_bounds = array<i64: 8, 1024>}, {transform_indices = @transform_1, window_bounds = array<i64: 8, 1024>}, {transform_indices = @transform_2, window_bounds = array<i64: 8, 1024>}]} {
    %c0 = arith.constant 0 : index
    %c0_0 = arith.constant 0 : index
    %0 = vector.load %arg2[%c0, %c0_0] : memref<8x1024xf32, #tpu.memory_space<vmem>>, vector<8x1024xf32>
    %c0_1 = arith.constant 0 : index
    %c0_2 = arith.constant 0 : index
    %1 = vector.load %arg1[%c0_1, %c0_2] : memref<8x1024xf32, #tpu.memory_space<vmem>>, vector<8x1024xf32>
    %2 = arith.cmpf ole, %0, %1 : vector<8x1024xf32>
    %3 = arith.extui %2 : vector<8x1024xi1> to vector<8x1024xi32>
    %4 = arith.sitofp %3 : vector<8x1024xi32> to vector<8x1024xf32>
    %c0_3 = arith.constant 0 : index
    %c0_4 = arith.constant 0 : index
    %5 = vector.load %arg3[%c0_3, %c0_4] : memref<8x1024xf32, #tpu.memory_space<vmem>>, vector<8x1024xf32>
    tpu.vector_store %arg3[%c0_3, %c0_4], %4 {strides = array<i32>} : memref<8x1024xf32, #tpu.memory_space<vmem>>, vector<8x1024xf32>,
    return
  }
  func.func @transform_0(%arg0: i32) -> (i32, i32) {
    %c0_i32 = arith.constant 0 : i32
    %c0_i32_0 = arith.constant 0 : i32
    return %arg0, %c0_i32 : i32, i32
  }
  func.func @transform_1(%arg0: i32) -> (i32, i32) {
    %c0_i32 = arith.constant 0 : i32
    %c0_i32_0 = arith.constant 0 : i32
    return %arg0, %c0_i32 : i32, i32
  }
  func.func @transform_2(%arg0: i32) -> (i32, i32) {
    %c0_i32 = arith.constant 0 : i32
    %c0_i32_0 = arith.constant 0 : i32
    return %arg0, %c0_i32 : i32, i32
  }
}

</mosaic_0001>

<bundles_post_ra>
// kernel: tpu_custom_call.1
= control target key start
LH: loop header
LB: loop body
LE: loop exit
PB: predicated region body
PF: predicated region fallthrough
CT: control target
= control target key end

     0   :  { %7 = vsyncpa [#allocation3], 0  ;;  %s224_s0 = inlined_call_operand.hbm [shape: f32[8,1024], index: 0, kind: input, shape index: {}]   ;;  %s225_s1 = inlined_call_operand.hbm [shape: f32[8,1024], index: 1, kind: input, shape index: {}]   ;;  %s226_s2 = inlined_call_operand.hbm [shape: f32[8,1024], index: 2, kind: output, shape index: {}]  }
   0x1   :  { %8 = vsyncpa [#allocation6], 0 }
   0x2   :  { %9 = vsyncpa [#allocation4], 0  ;;  %s15_s11 = sshll.u32 %s224_s0, 4  ;;  %s196_s12 = smov [#allocation2]   ;;  %s16_s11 = int_to_ptr.hbm [resolvable:$true] %s15_s11 }
   0x3   :  { %s17_s13 = sshll.u32 %s196_s12, 4  ;;  %s26_s16 = sshll.u32 %s225_s1, 4  ;;  %s18_s13 = int_to_ptr.vmem [resolvable:$true] %s17_s13  ;;  %s27_s16 = int_to_ptr.hbm [resolvable:$true] %s26_s16 }
   0x4   :  { %20 = dma.hbm_to_vmem [thread:$0]  %s16_s11, 1024, %s18_s13, [#allocation3]  }
   0x5   :  { %s197_s17 = smov [#allocation5]  }
   0x6   :  { %s28_s18 = sshll.u32 %s197_s17, 4  ;;  %s29_s18 = int_to_ptr.vmem [resolvable:$true] %s28_s18 }
   0x7   :  { %31 = dma.hbm_to_vmem [thread:$0]  %s27_s16, 1024, %s29_s18, [#allocation6]  }
   0x8   :  { %190 = dma.done.wait [#allocation3], 1024  }
   0x9   :  { %191 = vsyncadd [#allocation3], 4294966272 }
   0xa   :  { %192 = dma.done.wait [#allocation6], 1024  }
   0xb   :  { %193 = vsyncadd [#allocation6], 4294966272  ;;  %v40_v0 = vld [vmem:[#allocation5] sm:$0xff]  ;;  %v41_v2 = vld [vmem:[#allocation5 + $0x8] sm:$0xff]  ;;  %v198_v6 = vmov 0.0   ;;  %s199_s0 = smov [#allocation7]  }
   0xc   :  { %v48_v1 = vld [vmem:[#allocation2] sm:$0xff]  ;;  %v49_v3 = vld [vmem:[#allocation2 + $0x8] sm:$0xff]  ;;  %v42_v4 = vld [vmem:[#allocation5 + $0x10] sm:$0xff]  ;;  %s93_s1 = sshll.u32 %s199_s0, 4  ;;  %s95_s21 = sshll.u32 %s226_s2, 4  ;;  %s94_s1 = int_to_ptr.vmem [resolvable:$true] %s93_s1  ;;  %s96_s21 = int_to_ptr.hbm [resolvable:$true] %s95_s21 }
   0xd   :  { %vm56_vm0 = vcmp.le.f32.partialorder %v40_v0, %v48_v1  ;;  %v50_v5 = vld [vmem:[#allocation2 + $0x10] sm:$0xff]  ;;  %vm57_vm1 = vcmp.le.f32.partialorder %v41_v2, %v49_v3  ;;  %v43_v8 = vld [vmem:[#allocation5 + $0x18] sm:$0xff]  ;;  %v44_v10 = vld [vmem:[#allocation5 + $0x20] sm:$0xff] }
   0xe   :  { %v106_v7 = vsel %vm56_vm0, 1.0, %v198_v6  ;;  %vm58_vm2 = vcmp.le.f32.partialorder %v42_v4, %v50_v5  ;;  %v51_v9 = vld [vmem:[#allocation2 + $0x18] sm:$0xff]  ;;  %v107_v11 = vsel %vm57_vm1, 1.0, %v198_v6  ;;  %v52_v13 = vld [vmem:[#allocation2 + $0x20] sm:$0xff]  ;;  %v45_v14 = vld [vmem:[#allocation5 + $0x28] sm:$0xff] }
   0xf   :  { %80 = vst [vmem:[#allocation7] sm:$0xff] %v106_v7  ;;  %v108_v12 = vsel %vm58_vm2, 1.0, %v198_v6  ;;  %vm59_vm3 = vcmp.le.f32.partialorder %v43_v8, %v51_v9  ;;  %v53_v15 = vld [vmem:[#allocation2 + $0x28] sm:$0xff]  ;;  %vm60_vm4 = vcmp.le.f32.partialorder %v44_v10, %v52_v13  ;;  %v46_v17 = vld [vmem:[#allocation5 + $0x30] sm:$0xff]  ;;  %v47_v19 = vld [vmem:[#allocation5 + $0x38] sm:$0xff] }
  0x10   :  { %81 = vst [vmem:[#allocation7 + $0x8] sm:$0xff] %v107_v11  ;;  %v109_v16 = vsel %vm59_vm3, 1.0, %v198_v6  ;;  %vm61_vm5 = vcmp.le.f32.partialorder %v45_v14, %v53_v15  ;;  %v54_v18 = vld [vmem:[#allocation2 + $0x30] sm:$0xff]  ;;  %v110_v20 = vsel %vm60_vm4, 1.0, %v198_v6  ;;  %v55_v22 = vld [vmem:[#allocation2 + $0x38] sm:$0xff] }
  0x11   :  { %82 = vst [vmem:[#allocation7 + $0x10] sm:$0xff] %v108_v12  ;;  %v111_v21 = vsel %vm61_vm5, 1.0, %v198_v6  ;;  %vm62_vm6 = vcmp.le.f32.partialorder %v46_v17, %v54_v18  ;;  %vm63_vm7 = vcmp.le.f32.partialorder %v47_v19, %v55_v22 }
  0x12   :  { %83 = vst [vmem:[#allocation7 + $0x18] sm:$0xff] %v109_v16  ;;  %v112_v23 = vsel %vm62_vm6, 1.0, %v198_v6  ;;  %v113_v24 = vsel %vm63_vm7, 1.0, %v198_v6 }
  0x13   :  { %84 = vst [vmem:[#allocation7 + $0x20] sm:$0xff] %v110_v20 }
  0x14   :  { %85 = vst [vmem:[#allocation7 + $0x28] sm:$0xff] %v111_v21 }
  0x15   :  { %86 = vst [vmem:[#allocation7 + $0x30] sm:$0xff] %v112_v23 }
  0x16   :  { %87 = vst [vmem:[#allocation7 + $0x38] sm:$0xff] %v113_v24 }
  0x17   :  { %98 = dma.vmem_to_hbm [thread:$0]  %s94_s1, 1024, %s96_s21, [#allocation4]  }
  0x18   :  { %194 = dma.done.wait [#allocation4], 1024  }
  0x19   :  { %195 = vsyncadd [#allocation4], 4294966272 }
  0x1a   :  { %103 = vsyncpa [#allocation3], 1 }
  0x1b   :  { %104 = vsyncpa [#allocation6], 1 }
  0x1c   :  { %105 = vsyncpa [#allocation4], 1 }

</bundles_post_ra>
